<compile_context>
chip_gen: v7x
topology: tpu7x:2x2x1
jax: 0.10.0
libtpu: 0.0.40
codegen_flags: <defaults>
</compile_context>

<pallas_src>
import functools

import jax
import jax.numpy as jnp
from jax import lax
from jax.experimental import pallas as pl
from jax.experimental.pallas import tpu as pltpu


def _round_up(x: int, m: int) -> int:
    return (x + m - 1) // m * m


def _lm_head_kernel(x_ref, w_ref, o_ref, *, compute_dtype):
    # x_ref: (tm, K)  activation tile
    # w_ref: (tn, K)  weight tile in native (vocab, n_embd) layout
    # o_ref: (tm, tn) f32 logits tile
    x = x_ref[...].astype(compute_dtype)
    w = w_ref[...].astype(compute_dtype)
    # Contract over K (dim 1 of both operands): result is (tm, tn) == x @ w.T
    o_ref[...] = lax.dot_general(
        x,
        w,
        dimension_numbers=(((1,), (1,)), ((), ())),
        preferred_element_type=jnp.float32,
    ).astype(o_ref.dtype)


def gpt2_lm_head(
    hidden_states: jax.Array,
    weight: jax.Array,
    *,
    tm: int = 256,
    tn: int = 1024,
    compute_dtype=jnp.bfloat16,
):
    """hidden_states: (B, S, n_embd); weight: (vocab, n_embd) (PyTorch Linear layout).

    Returns float32 logits of shape (B, S, vocab).
    """
    B, S, K = hidden_states.shape
    V, K2 = weight.shape
    assert K == K2, "n_embd mismatch between hidden_states and lm_head weight"

    M = B * S

    # Clamp tiles to the (aligned) problem size; keep sublane/lane alignment.
    tm = min(tm, _round_up(M, 8))
    tn = min(tn, _round_up(V, 128))

    Mp = _round_up(M, tm)
    Vp = _round_up(V, tn)

    x2d = hidden_states.reshape(M, K)
    if Mp != M:
        x2d = jnp.pad(x2d, ((0, Mp - M), (0, 0)))
    w = weight
    if Vp != V:
        # Pad vocab to the tile multiple (keeps output stores lane-dense).
        w = jnp.pad(w, ((0, Vp - V), (0, 0)))

    grid = (Mp // tm, Vp // tn)

    # Explicit VMEM budget: double-buffered X, W and output tiles + headroom.
    x_item = jnp.dtype(x2d.dtype).itemsize
    w_item = jnp.dtype(w.dtype).itemsize
    tile_bytes = 2 * (tm * K * x_item + tn * K * w_item + tm * tn * 4)
    vmem_limit = min(max(int(tile_bytes * 1.5) + (4 << 20), 32 << 20), 64 << 20)

    kernel = functools.partial(_lm_head_kernel, compute_dtype=compute_dtype)

    out2d = pl.pallas_call(
        kernel,
        out_shape=jax.ShapeDtypeStruct((Mp, Vp), jnp.float32),
        grid_spec=pltpu.PrefetchScalarGridSpec(
            num_scalar_prefetch=0,
            grid=grid,
            in_specs=[
                # Activation row stripe; constant across the vocab axis, so the
                # block stays resident while the weight streams past it.
                pl.BlockSpec((tm, K), lambda i, j: (i, 0)),
                # Contiguous row stripe of the native (V, K) weight.
                pl.BlockSpec((tn, K), lambda i, j: (j, 0)),
            ],
            out_specs=pl.BlockSpec((tm, tn), lambda i, j: (i, j)),
        ),
        compiler_params=pltpu.CompilerParams(
            dimension_semantics=("parallel", "parallel"),
            vmem_limit_bytes=vmem_limit,
        ),
    )(x2d, w)

    out2d = out2d[:M, :V]
    return out2d.reshape(B, S, V)


if __name__ == "__main__":
    # Small GPT-2-like config: n_embd=32, vocab_size=256, batch=2, seq=8.
    batch, seq, n_embd, vocab_size = 2, 8, 32, 256

    key = jax.random.PRNGKey(0)
    k_x, k_w = jax.random.split(key)

    hidden_states = jax.random.normal(k_x, (batch, seq, n_embd), dtype=jnp.float32)
    # Deterministic init of lm_head.weight (PyTorch shape: (vocab_size, n_embd)).
    lm_head_weight = (
        jax.random.normal(k_w, (vocab_size, n_embd), dtype=jnp.float32) * 0.02
    )

    logits = gpt2_lm_head(hidden_states, lm_head_weight)
    logits = jax.block_until_ready(logits)

    # Cross-check against plain JAX f32 reference (bf16 MXU compute, f32 accum).
    ref = jnp.einsum("bsk,vk->bsv", hidden_states, lm_head_weight)
    assert logits.shape == (batch, seq, vocab_size)
    assert logits.dtype == jnp.float32
    assert jnp.allclose(logits, ref, atol=1e-2, rtol=1e-2), (
        float(jnp.max(jnp.abs(logits - ref)))
    )

    print("KERNEL_OK")
</pallas_src>

<mosaic_0001>
module attributes {stable_mosaic.version = 11 : i64} {
  func.func @_lm_head_kernel(%arg0: i32, %arg1: i32, %arg2: memref<16x32xf32, #tpu.memory_space<vmem>>, %arg3: memref<256x32xf32, #tpu.memory_space<vmem>>, %arg4: memref<16x256xf32, #tpu.memory_space<vmem>>) attributes {dimension_semantics = [#tpu.dimension_semantics<parallel>, #tpu.dimension_semantics<parallel>], iteration_bounds = array<i64: 1, 1>, scalar_prefetch = 0 : i64, scratch_operands = 0 : i64, tpu.core_type = #tpu.core_type<tc>, window_params = [{transform_indices = @transform_0, window_bounds = array<i64: 16, 32>}, {transform_indices = @transform_1, window_bounds = array<i64: 256, 32>}, {transform_indices = @transform_2, window_bounds = array<i64: 16, 256>}]} {
    %c0 = arith.constant 0 : index
    %c0_0 = arith.constant 0 : index
    %0 = vector.load %arg2[%c0, %c0_0] : memref<16x32xf32, #tpu.memory_space<vmem>>, vector<16x32xf32>
    %1 = arith.truncf %0 : vector<16x32xf32> to vector<16x32xbf16>
    %c0_1 = arith.constant 0 : index
    %c0_2 = arith.constant 0 : index
    %2 = vector.load %arg3[%c0_1, %c0_2] : memref<256x32xf32, #tpu.memory_space<vmem>>, vector<256x32xf32>
    %3 = arith.truncf %2 : vector<256x32xf32> to vector<256x32xbf16>
    %cst = arith.constant dense<0.000000e+00> : vector<16x256xf32>
    %4 = tpu.matmul %1, %3, %cst {dimension_numbers = #tpu.dot_dimension_numbers<[1], [1], [0], [0], [0, 0, 1, 0], [], []>} : vector<16x32xbf16>, vector<256x32xbf16>, vector<16x256xf32> -> vector<16x256xf32>
    %c0_3 = arith.constant 0 : index
    %c0_4 = arith.constant 0 : index
    %5 = vector.load %arg4[%c0_3, %c0_4] : memref<16x256xf32, #tpu.memory_space<vmem>>, vector<16x256xf32>
    tpu.vector_store %arg4[%c0_3, %c0_4], %4 {strides = array<i32>} : memref<16x256xf32, #tpu.memory_space<vmem>>, vector<16x256xf32>,
    return
  }
  func.func @transform_0(%arg0: i32, %arg1: i32) -> (i32, i32) {
    %c0_i32 = arith.constant 0 : i32
    %c0_i32_0 = arith.constant 0 : i32
    return %arg0, %c0_i32 : i32, i32
  }
  func.func @transform_1(%arg0: i32, %arg1: i32) -> (i32, i32) {
    %c0_i32 = arith.constant 0 : i32
    %c0_i32_0 = arith.constant 0 : i32
    return %arg1, %c0_i32 : i32, i32
  }
  func.func @transform_2(%arg0: i32, %arg1: i32) -> (i32, i32) {
    %c0_i32 = arith.constant 0 : i32
    return %arg0, %arg1 : i32, i32
  }
}

</mosaic_0001>

<bundles_post_ra>
// kernel: tpu_custom_call.1
= control target key start
LH: loop header
LB: loop body
LE: loop exit
PB: predicated region body
PF: predicated region fallthrough
CT: control target
= control target key end

     0   :  { %vm64_vm0 = vcmask 261120   ;;  %s383_s0 = inlined_call_operand.vmem [shape: f32[16,32], index: 0, kind: input, shape index: {}]   ;;  %s384_s1 = inlined_call_operand.vmem [shape: f32[256,32], index: 1, kind: input, shape index: {}]   ;;  %s385_s2 = inlined_call_operand.hbm [shape: f32[16,256], index: 2, kind: output, shape index: {}]  }
   0x1   :  { %v32_v0 = vld [vmem:[%s384_s1 + $0x80] sm:$0xff]  ;;  %v33_v1 = vld [vmem:[%s384_s1 + $0x88] sm:$0xff]  ;;  %v34_v5 = vld [vmem:[%s384_s1 + $0x90] sm:$0xff] }
   0x2   :  { %v16_v2 = vld [vmem:[%s384_s1] sm:$0xff]  ;;  %v56_v3 = vpack.c.bf16 %v33_v1, %v32_v0  ;;  %v17_v4 = vld [vmem:[%s384_s1 + $0x8] sm:$0xff]  ;;  %v35_v6 = vld [vmem:[%s384_s1 + $0x98] sm:$0xff] }
   0x3   :  { %v48_v7 = vpack.c.bf16 %v17_v4, %v16_v2  ;;  %v57_v8 = vpack.c.bf16 %v35_v6, %v34_v5  ;;  %v18_v9 = vld [vmem:[%s384_s1 + $0x10] sm:$0xff]  ;;  %v19_v10 = vld [vmem:[%s384_s1 + $0x18] sm:$0xff]  ;;  %v36_v13 = vld [vmem:[%s384_s1 + $0xa0] sm:$0xff] }
   0x4   :  { %198 = vmatprep.subr.msk.bf16.mxu0 %vm64_vm0, %v56_v3  ;;  %v49_v12 = vpack.c.bf16 %v19_v10, %v18_v9  ;;  %v37_v14 = vld [vmem:[%s384_s1 + $0xa8] sm:$0xff]  ;;  %v20_v17 = vld [vmem:[%s384_s1 + $0x20] sm:$0xff] }
   0x5   :  { %v69_v11 = vsel %vm64_vm0, %v48_v7, 0  ;;  %v58_v16 = vpack.c.bf16 %v37_v14, %v36_v13  ;;  %v13_v18 = vld [vmem:[%s383_s0] sm:$0xff]  ;;  %v21_v19 = vld [vmem:[%s384_s1 + $0x28] sm:$0xff] }
   0x6   :  { %181 = vmatpush3.bf16.xpose.msra.mxu0 %v69_v11  ;;  %v72_v15 = vsel %vm64_vm0, %v49_v12, 0  ;;  %v14_v20 = vld [vmem:[%s383_s0 + $0x8] sm:$0xff] }
   0x7   :  { %199 = vmatprep.subr.msk.bf16.mxu0 %vm64_vm0, %v57_v8 }
   0x8   :  { %7 = vsyncpa [#allocation3], 0  ;;  %v15_v21 = vpack.c.bf16 %v14_v20, %v13_v18  ;;  %v50_v22 = vpack.c.bf16 %v21_v19, %v20_v17  ;;  %v38_v23 = vld [vmem:[%s384_s1 + $0xb0] sm:$0xff]  ;;  %v39_v24 = vld [vmem:[%s384_s1 + $0xb8] sm:$0xff]  ;;  %s233_s19 = smov [#allocation2]  }
   0x9   :  { %v59_v26 = vpack.c.bf16 %v39_v24, %v38_v23  ;;  %v22_v27 = vld [vmem:[%s384_s1 + $0x30] sm:$0xff]  ;;  %v23_v28 = vld [vmem:[%s384_s1 + $0x38] sm:$0xff]  ;;  %v40_v30 = vld [vmem:[%s384_s1 + $0xc0] sm:$0xff]  ;;  %s168_s20 = sshll.u32 %s233_s19, 4  ;;  %s169_s20 = int_to_ptr.vmem [resolvable:$true] %s168_s20 }
   0xa   :  { %196 = vmatprep.mubr.msk.bf16.mxu0 %vm64_vm0, %v15_v21  ;;  %v75_v25 = vsel %vm64_vm0, %v50_v22, 0  ;;  %v51_v29 = vpack.c.bf16 %v23_v28, %v22_v27  ;;  %v41_v31 = vld [vmem:[%s384_s1 + $0xc8] sm:$0xff]  ;;  %v24_v34 = vld [vmem:[%s384_s1 + $0x40] sm:$0xff]  ;;  %v42_v37 = vld [vmem:[%s384_s1 + $0xd0] sm:$0xff]  ;;  %p214_p1 = scmp.lt.s32.totalorder %s169_s20, %s169_s20 }
   0xb   :  { %v60_v33 = vpack.c.bf16 %v41_v31, %v40_v30  ;;  %v25_v35 = vld [vmem:[%s384_s1 + $0x48] sm:$0xff]  ;;  %v43_v38 = vld [vmem:[%s384_s1 + $0xd8] sm:$0xff]  ;;  %v26_v41 = vld [vmem:[%s384_s1 + $0x50] sm:$0xff] }
   0xc   :  { %v78_v32 = vsel %vm64_vm0, %v51_v29, 0  ;;  %v52_v36 = vpack.c.bf16 %v25_v35, %v24_v34  ;;  %v61_v40 = vpack.c.bf16 %v43_v38, %v42_v37  ;;  %v27_v42 = vld [vmem:[%s384_s1 + $0x58] sm:$0xff]  ;;  %v44_v44 = vld [vmem:[%s384_s1 + $0xe0] sm:$0xff]  ;;  %v45_v45 = vld [vmem:[%s384_s1 + $0xe8] sm:$0xff] }
   0xd   :  { %v53_v43 = vpack.c.bf16 %v27_v42, %v26_v41  ;;  %v62_v47 = vpack.c.bf16 %v45_v45, %v44_v44  ;;  %v28_v48 = vld [vmem:[%s384_s1 + $0x60] sm:$0xff]  ;;  %v29_v49 = vld [vmem:[%s384_s1 + $0x68] sm:$0xff]  ;;  %v46_v51 = vld [vmem:[%s384_s1 + $0xf0] sm:$0xff] }
   0xe   :  { %183 = vmatpush3.bf16.xpose.msra.mxu0 %v72_v15  ;;  %v81_v39 = vsel %vm64_vm0, %v52_v36, 0  ;;  %v54_v50 = vpack.c.bf16 %v29_v49, %v28_v48  ;;  %v47_v52 = vld [vmem:[%s384_s1 + $0xf8] sm:$0xff]  ;;  %v30_v55 = vld [vmem:[%s384_s1 + $0x70] sm:$0xff] }
   0xf   :  { %200 = vmatprep.subr.msk.bf16.mxu0 %vm64_vm0, %v58_v16  ;;  %v84_v46 = vsel %vm64_vm0, %v53_v43, 0  ;;  %v63_v54 = vpack.c.bf16 %v47_v52, %v46_v51  ;;  %v31_v56 = vld [vmem:[%s384_s1 + $0x78] sm:$0xff]  ;;  %s209_s1 = scalar_lea.vmem %s169_s20, 512 }
  0x10   :  { %v87_v53 = vsel %vm64_vm0, %v54_v50, 0  ;;  %v55_v57 = vpack.c.bf16 %v31_v56, %v30_v55  ;;  %p210_p0 = scmp.ne.s32.totalorder %s169_s20, %s209_s1  ;;  %p215_p2 = scmp.lt.s32.totalorder %s209_s1, %s209_s1 }
  0x12   :  { %v90_v58 = vsel %vm64_vm0, %v55_v57, 0  ;;  %p216_p3 = por %p215_p2, %p214_p1 }
  0x14   :  { %p217_p4 = pnand %p216_p3, %p210_p0 }
  0x16   :  { %185 = vmatpush3.bf16.xpose.msra.mxu0 %v75_v25 }
  0x17   :  { %201 = vmatprep.subr.msk.bf16.mxu0 %vm64_vm0, %v59_v26 }
  0x1e   :  { %187 = vmatpush3.bf16.xpose.msra.mxu0 %v78_v32 }
  0x1f   :  { %202 = vmatprep.subr.msk.bf16.mxu0 %vm64_vm0, %v60_v33 }
  0x26   :  { %189 = vmatpush3.bf16.xpose.msra.mxu0 %v81_v39 }
  0x27   :  { %203 = vmatprep.subr.msk.bf16.mxu0 %vm64_vm0, %v61_v40 }
  0x2e   :  { %191 = vmatpush3.bf16.xpose.msra.mxu0 %v84_v46 }
  0x2f   :  { %204 = vmatprep.subr.msk.bf16.mxu0 %vm64_vm0, %v62_v47 }
  0x36   :  { %193 = vmatpush3.bf16.xpose.msra.mxu0 %v87_v53 }
  0x37   :  { %205 = vmatprep.subr.msk.bf16.mxu0 %vm64_vm0, %v63_v54 }
  0x3e   :  { %195 = vmatpush3.bf16.xpose.msra.mxu0 %v90_v58 }
  0x45   :  { %197 = vmatmul.mubr.msk.bf16.vlgmr.msra.gmra.mrb[0].mxu0 %vm64_vm0, %v15_v21 }
 0x118   :  { %v150_v59 = vpop.f32.mrb[0].mxu0 }
 0x119   :  { %159 = vst [vmem:[#allocation2] sm:$0xff] %v150_v59  ;;  %v152_v60 = vpop.f32.mrb[1].mxu0 }
 0x11a   :  { %160 = vst [vmem:[#allocation2 + $0x8] sm:$0xff] %v152_v60  ;;  %v154_v61 = vpop.f32.mrb[2].mxu0 }
 0x11b   :  { %161 = vst [vmem:[#allocation2 + $0x10] sm:$0xff] %v154_v61  ;;  %v156_v62 = vpop.f32.mrb[3].mxu0 }
 0x11c   :  { %162 = vst [vmem:[#allocation2 + $0x18] sm:$0xff] %v156_v62 }
 0x11d   :  { %220 = shalt.err (!%p217_p4)
}
 0x11e   :  { %s221_s23 = scalar_lea.hbm %s385_s2, 512 }
 0x11f   :  { %p222_p5 = scmp.ne.s32.totalorder %s385_s2, %s221_s23  ;;  %p225_p6 = scmp.lt.u32.totalorder %s221_s23, %s385_s2 }
 0x121   :  { %p227_p7 = pnand %p225_p6, %p222_p5 }
 0x123   :  { %230 = shalt.err (!%p227_p7)
}
 0x124   :  { %s234_s28 = smov 256   ;;  %s235_s29 = smov 16  }
 0x125   :  { %174 = dma.vmem_to_hbm [thread:$0]  %s169_s20, 512, %s385_s2, [#allocation3], %s234_s28, %s234_s28, %s235_s29  }
 0x126   :  { %231 = dma.done.wait [#allocation3], 512  }
 0x127   :  { %232 = vsyncadd [#allocation3], 4294966784 }
 0x128   :  { %178 = vsyncpa [#allocation3], 1 }

</bundles_post_ra>
